<compile_context>
chip_gen: v5e
topology: v5e:2x2
jax: 0.10.0
libtpu: 0.0.40
codegen_flags: <defaults>
</compile_context>

<pallas_src>
import jax
import jax.numpy as jnp
from jax.experimental import pallas as pl
from jax.experimental.pallas import tpu as pltpu


_LANE = 128
_VMEM_PIPELINE_BUDGET = 24 << 20   # bytes for the double-buffered in/out tiles


def _round_up(x, m):
    return ((x + m - 1) // m) * m


def _tconv_kernel(w_ref, x_ref, o_ref):
    # w_ref: (R, Cin)   x_ref: (Cin, tile_s)   o_ref: (R, tile_s), R = Cout*8.
    # f32 accumulation in the MXU; cast only on the store (bf16 output option).
    o_ref[...] = jnp.dot(
        w_ref[...], x_ref[...], preferred_element_type=jnp.float32
    ).astype(o_ref.dtype)


def _choose_spatial_tile(s_total, per_col_bytes, *, max_tile_s, min_tiles=4):
    """Pick a lane-dense spatial tile.

    Returns (tile_s, padded_S).  tile_s is a multiple of 128 (or the full,
    un-tiled extent for tiny volumes), sized so the double-buffered in+out
    tiles stay inside the VMEM pipeline budget, and small enough that the
    spatial axis yields >= min_tiles grid steps whenever S >= 256 (keeps both
    v7x TensorCores busy and lets the pipeline hide DMA at step boundaries).
    """
    if s_total <= _LANE:
        return s_total, s_total                       # single full-extent block

    cap = _VMEM_PIPELINE_BUDGET // max(per_col_bytes, 1)
    cap = max(_LANE, (min(cap, max_tile_s) // _LANE) * _LANE)

    if s_total >= 2 * _LANE:
        want = min(min_tiles, s_total // _LANE)       # 2..min_tiles grid steps
        cap = max(_LANE, min(cap, _round_up(pl.cdiv(s_total, want), _LANE)))

    # Prefer an exact tiling (no padding, no extra copies).
    t = cap
    while t >= _LANE:
        if s_total % t == 0:
            return t, s_total
        t -= _LANE

    # Ragged fallback: pad only up to the next multiple of 128.
    s_pad = _round_up(s_total, _LANE)
    t = cap
    while t >= _LANE:
        if s_pad % t == 0:
            return t, s_pad
        t -= _LANE
    return _LANE, s_pad


def transp_conv3d_block(x, weight, *, out_dtype=None, max_tile_s=4096):
    """ConvTranspose3d, kernel=2, stride=2, padding=0, bias=False.

    x:      (N, Cin, D, H, W)     float32, NCDHW (PyTorch layout)
    weight: (Cin, Cout, 2, 2, 2)  PyTorch ConvTranspose3d weight layout
    out_dtype: output dtype; default x.dtype (float32) for exact parity with
        the PyTorch module.  jnp.bfloat16 halves the write-bound HBM traffic
        (accumulation stays float32; only the store / interleave run in bf16).
    returns (N, Cout, 2D, 2H, 2W)
    """
    N, Cin, D, H, W = x.shape
    Cout = weight.shape[1]
    out_dtype = x.dtype if out_dtype is None else jax.dtypes.canonicalize_dtype(out_dtype)
    R = Cout * 8                      # output row r = co*8 + kd*4 + kh*2 + kw
    S = D * H * W

    # Free reshape (no transpose): NCDHW -> (N, Cin, S); spatial goes on lanes.
    xs = x.reshape(N, Cin, S)
    # Weight -> (R, Cin); tiny, transposed once outside the kernel.
    wr = weight.reshape(Cin, R).T

    in_b = xs.dtype.itemsize
    out_b = out_dtype.itemsize
    per_col = 2 * (Cin * in_b + R * out_b)        # double-buffered bytes / lane
    tile_s, s_pad = _choose_spatial_tile(S, per_col, max_tile_s=max_tile_s)
    if s_pad != S:
        # Rare path (S not a multiple of 128): pad by < 128 columns only.
        xs = jnp.pad(xs, ((0, 0), (0, 0), (0, s_pad - S)))
    n_s = s_pad // tile_s

    working_set = per_col * tile_s + 2 * R * Cin * wr.dtype.itemsize
    # Explicit scoped-VMEM limit: above v5e's 16 MiB default, >=2x headroom over
    # the working set, and <= v7x's 64 MiB physical VMEM.
    vmem_limit = int(min(max(2 * working_set + (8 << 20), 32 << 20), 56 << 20))

    ym = pl.pallas_call(
        _tconv_kernel,
        out_shape=jax.ShapeDtypeStruct((N, R, s_pad), out_dtype),
        grid_spec=pltpu.PrefetchScalarGridSpec(
            num_scalar_prefetch=0,
            grid=(N, n_s),
            in_specs=[
                # Tiny weight block, resident across the whole grid.
                pl.BlockSpec((R, Cin), lambda n, s: (0, 0)),
                # Lane-dense spatial tile of the input (batch dim squeezed).
                # (pl.Buffered(3) on this spec is a further knob if profiling
                #  ever shows exposed input-DMA latency; not needed so far.)
                pl.BlockSpec((None, Cin, tile_s), lambda n, s: (n, 0, s)),
            ],
            out_specs=pl.BlockSpec((None, R, tile_s), lambda n, s: (n, 0, s)),
        ),
        compiler_params=pltpu.CompilerParams(
            dimension_semantics=("parallel", "parallel"),
            vmem_limit_bytes=vmem_limit,
        ),
    )(wr, xs)

    if s_pad != S:
        ym = ym[:, :, :S]             # fuses into the interleave below

    # Non-overlapping stride-2 scatter of each voxel's 2x2x2 block.  This is the
    # one remaining output-sized XLA pass (see TODO at top); it runs in
    # out_dtype, so the bf16 option halves it.
    y = ym.reshape(N, Cout, 2, 2, 2, D, H, W)
    y = jnp.transpose(y, (0, 1, 5, 2, 6, 3, 7, 4))   # (N,Cout,D,kd,H,kh,W,kw)
    return y.reshape(N, Cout, 2 * D, 2 * H, 2 * W)


def _reference(x, weight):
    """Independent pure-JAX reference (no Pallas), strided-scatter form."""
    N, Cin, D, H, W = x.shape
    Cout = weight.shape[1]
    y = jnp.zeros((N, Cout, 2 * D, 2 * H, 2 * W), dtype=x.dtype)
    for kd in range(2):
        for kh in range(2):
            for kw in range(2):
                blk = jnp.einsum("ncdhw,co->nodhw", x, weight[:, :, kd, kh, kw])
                y = y.at[:, :, kd::2, kh::2, kw::2].set(blk)
    return y


if __name__ == "__main__":
    key = jax.random.PRNGKey(0)
    k_x, k_w = jax.random.split(key)

    batch, in_planes, out_planes, spatial = 2, 4, 8, 8
    x = jax.random.normal(
        k_x, (batch, in_planes, spatial, spatial, spatial), jnp.float32
    )
    # Deterministic "init" of the ConvTranspose3d weight: (in, out, 2, 2, 2)
    weight = 0.1 * jax.random.normal(
        k_w, (in_planes, out_planes, 2, 2, 2), jnp.float32
    )

    y_ref = _reference(x, weight)

    # Default path: float32 output, exact parity with nn.ConvTranspose3d.
    y = jax.block_until_ready(transp_conv3d_block(x, weight))
    assert y.shape == (batch, out_planes, 2 * spatial, 2 * spatial, 2 * spatial)
    assert y.dtype == jnp.float32
    assert jnp.allclose(y, y_ref, atol=1e-5, rtol=1e-5)

    # bf16-output perf option: f32 accumulation, bf16 store + bf16 interleave.
    y_bf16 = jax.block_until_ready(
        transp_conv3d_block(x, weight, out_dtype=jnp.bfloat16)
    )
    assert y_bf16.dtype == jnp.bfloat16
    assert jnp.allclose(y_bf16.astype(jnp.float32), y_ref, atol=3e-2, rtol=3e-2)

    print("KERNEL_OK")
</pallas_src>

<mosaic_0001>
module attributes {stable_mosaic.version = 11 : i64} {
  func.func @_tconv_kernel(%arg0: i32, %arg1: i32, %arg2: memref<64x4xf32, #tpu.memory_space<vmem>>, %arg3: memref<1x4x128xf32, #tpu.memory_space<vmem>>, %arg4: memref<1x64x128xf32, #tpu.memory_space<vmem>>) attributes {dimension_semantics = [#tpu.dimension_semantics<parallel>, #tpu.dimension_semantics<parallel>], iteration_bounds = array<i64: 2, 4>, scalar_prefetch = 0 : i64, scratch_operands = 0 : i64, tpu.core_type = #tpu.core_type<tc>, window_params = [{pipeline_mode = #tpu.pipeline_mode<synchronous>, transform_indices = @transform_0, window_bounds = array<i64: 64, 4>}, {transform_indices = @transform_1, window_bounds = array<i64: 1, 4, 128>}, {transform_indices = @transform_2, window_bounds = array<i64: 1, 64, 128>}]} {
    %c0 = arith.constant 0 : index
    %c0_0 = arith.constant 0 : index
    %0 = vector.load %arg2[%c0, %c0_0] : memref<64x4xf32, #tpu.memory_space<vmem>>, vector<64x4xf32>
    %c0_1 = arith.constant 0 : index
    %c0_2 = arith.constant 0 : index
    %c0_3 = arith.constant 0 : index
    %1 = vector.load %arg3[%c0_1, %c0_2, %c0_3] : memref<1x4x128xf32, #tpu.memory_space<vmem>>, vector<1x4x128xf32>
    %2 = vector.shape_cast %1 : vector<1x4x128xf32> to vector<4x128xf32>
    %cst = arith.constant dense<0.000000e+00> : vector<64x128xf32>
    %3 = tpu.matmul %0, %2, %cst {dimension_numbers = #tpu.dot_dimension_numbers<[1], [0], [0], [1], [0, 0, 1, 1], [], []>} : vector<64x4xf32>, vector<4x128xf32>, vector<64x128xf32> -> vector<64x128xf32>
    %c0_4 = arith.constant 0 : index
    %c0_5 = arith.constant 0 : index
    %c0_6 = arith.constant 0 : index
    %4 = vector.load %arg4[%c0_4, %c0_5, %c0_6] : memref<1x64x128xf32, #tpu.memory_space<vmem>>, vector<1x64x128xf32>
    %5 = vector.shape_cast %4 : vector<1x64x128xf32> to vector<64x128xf32>
    %6 = vector.shape_cast %3 : vector<64x128xf32> to vector<1x64x128xf32>
    tpu.vector_store %arg4[%c0_4, %c0_5, %c0_6], %6 {strides = array<i32>} : memref<1x64x128xf32, #tpu.memory_space<vmem>>, vector<1x64x128xf32>,
    return
  }
  func.func @transform_0(%arg0: i32, %arg1: i32) -> (i32, i32) {
    %c0_i32 = arith.constant 0 : i32
    %c0_i32_0 = arith.constant 0 : i32
    %c0_i32_1 = arith.constant 0 : i32
    return %c0_i32, %c0_i32_0 : i32, i32
  }
  func.func @transform_1(%arg0: i32, %arg1: i32) -> (i32, i32, i32) {
    %c0_i32 = arith.constant 0 : i32
    %c0_i32_0 = arith.constant 0 : i32
    return %arg0, %c0_i32, %arg1 : i32, i32, i32
  }
  func.func @transform_2(%arg0: i32, %arg1: i32) -> (i32, i32, i32) {
    %c0_i32 = arith.constant 0 : i32
    %c0_i32_0 = arith.constant 0 : i32
    return %arg0, %c0_i32, %arg1 : i32, i32, i32
  }
}

</mosaic_0001>

<bundles_post_ra>
// kernel: tpu_custom_call.1
= control target key start
LH: loop header
LB: loop body
LE: loop exit
PB: predicated region body
PF: predicated region fallthrough
CT: control target
= control target key end

     0   :  { %7 = vsyncpa [#allocation3], 0  ;;  %s719_s0 = inlined_call_operand.vmem [shape: f32[64,4], index: 0, kind: input, shape index: {}]   ;;  %s720_s1 = inlined_call_operand.vmem [shape: f32[2,4,512], index: 1, kind: input, shape index: {}]   ;;  %s721_s2 = inlined_call_operand.hbm [shape: f32[2,64,512], index: 2, kind: output, shape index: {}]  }
   0x1   :  { %9 = vsyncpa [#allocation3 + $0x1], 0  ;;  %s565_s9 = smov 0   ;;  %s567_s10 = smov 0  }
   0x2   :  { %s569_s11 = smov 0   ;;  %s571_s12 = smov 0  }
   0x3   :  { %s573_s13 = smov 0   ;;  %s575_s14 = smov 0  }
   0x4   :  { %s577_s15 = smov 0   ;;  %s579_s16 = smov 0  }
   0x5 LB: > { %s352_s17 = sadd.s32 4294967295, %s545_s16   ;;  %s353_s18 = sadd.s32 4294967294, %s545_s16   ;;  %s545_s16 = sphi %s579_s16, %s15_s16   ;;  %s541_s15 = sphi %s577_s15, %s730_s15   ;;  %s537_s14 = sphi %s575_s14, %s729_s14   ;;  %s533_s13 = sphi %s573_s13, %s728_s13   ;;  %s529_s12 = sphi %s571_s12, %s727_s12   ;;  %s525_s11 = sphi %s569_s11, %s726_s11   ;;  %s521_s10 = sphi %s567_s10, %s725_s10   ;;  %s517_s9 = sphi %s565_s9, %s724_s9  }
   0x6   : > { %s24_s19 = sadd.s32 1, %s537_s14  ;;  %s27_s20 = sadd.s32 1, %s541_s15 }
   0x7   : > { %p25_p0 = scmp.ge.s32.totalorder %s24_s19, 4  ;;  %p95_p1 = scmp.ne.s32.totalorder %s525_s11, %s521_s10 }
   0x8   : > { %p96_p2 = scmp.eq.s32.totalorder %s352_s17, 7  ;;  %p101_p5 = scmp.ne.s32.totalorder %s521_s10, %s517_s9 }
   0x9   : > { %s732_s19 = smov (%p25_p0, %s24_s19), 0  ;;  %s734_s20 = smov (!%p25_p0, %s27_s20), %s541_s15 }
   0xa   : > { %s81_s21 = ssub.s32 %s537_s14, %s732_s19  ;;  %p616_p3 = por %p96_p2, %p95_p1 }
   0xb   : > { %p29_p4 = scmp.ge.s32.totalorder %s734_s20, 2  ;;  %p102_p6 = scmp.eq.s32.totalorder %s353_s18, 7 }
   0xc   : > { %p356_p7 = scmp.ge.s32.totalorder %s545_s16, 1  ;;  %p134_p9 = scmp.lt.s32.totalorder %s545_s16, 9 }
   0xd   : > { %s736_s20 = smov (%p29_p4, %s734_s20), 0  ;;  %p625_p8 = por %p102_p6, %p101_p5 }
   0xe   : > { %s80_s24 = ssub.s32 %s541_s15, %s736_s20  ;;  %s85_s25 = sadd.s32 1, %s525_s11 }
   0xf   : > { %s82_s26 = sor.u32 %s81_s21, %s80_s24  ;;  %p135_p10 = pnand %p356_p7, %p134_p9 }
  0x10   : > { %p83_p11 = scmp.eq.s32.totalorder %s82_s26, 0  ;;  %p159_p12 = scmp.lt.s32.totalorder (!%p135_p10), %s533_s13, 1 }
  0x11   : > { %138 = sbr.rel (%p135_p10) target bundleno = 176 (0xb0), region = 28  ;;  %p161_p13 = scmp.lt.s32.totalorder (!%p135_p10), %s529_s12, 3 }
  0x12   : > { %s634_s27 = scalar_select %p83_p11, %s525_s11, %s85_s25  }
  0x13   : > { %s156_s17 = sand.u32 (!%p135_p10), 1, %s521_s10   ;;  %s370_s21 = sshll.u32 (!%p135_p10), %s533_s13, 5 }
  0x14   : > { %s357_s18 = sshll.u32 (!%p135_p10), %s156_s17, 6  ;;  %s265_s24 = sadd.s32 (!%p135_p10), %s529_s12, %s370_s21 }
  0x15   : > { %s158_s25 = scalar_lea.vmem (!%p135_p10), [#allocation2], %s357_s18  ;;  %s371_s26 = sshll.u32 (!%p135_p10), %s265_s24, 3 }
  0x16   : > { %s160_s28 = scalar_select %p159_p12, %s533_s13, 1  ;;  %vm201_vm0 = vcmask 1043456   ;;  %v171_v0 = vld [vmem:[%s719_s0 + $0x20] sm:$0xff]  ;;  %vm176_vm1 = vcmask 31744   ;;  %v173_v1 = vld [vmem:[%s719_s0 + $0x30] sm:$0xff]  ;;  %v172_v5 = vld [vmem:[%s719_s0 + $0x28] sm:$0xff] }
  0x17   : > { %s162_s29 = scalar_select %p161_p13, %s529_s12, 3  ;;  %v167_v3 = vld [vmem:[%s719_s0] sm:$0xff]  ;;  %v169_v4 = vld [vmem:[%s719_s0 + $0x10] sm:$0xff]  ;;  %v174_v6 = vld [vmem:[%s719_s0 + $0x38] sm:$0xff] }
  0x18   : > { %s358_s30 = sshll.u32 %s160_s28, 2  ;;  %v168_v7 = vld [vmem:[%s719_s0 + $0x8] sm:$0xff]  ;;  %v170_v8 = vld [vmem:[%s719_s0 + $0x18] sm:$0xff]  ;;  %s255_s12 = scalar_lea.sflag [#allocation3], %s156_s17 }
  0x19   : > { %s164_s3 = sadd.s32 %s358_s30, %s162_s29  ;;  %s267_s30 = scalar_lea.hbm %s721_s2, %s371_s26 }
  0x1a   : > { %s359_s4 = sshll.u32 %s164_s3, 2  ;;  %s268_s3 = sshll.u32 %s158_s25, 4  ;;  %s269_s3 = int_to_ptr.vmem [resolvable:$true] %s268_s3 }
  0x1b   : > { %s166_s7 = scalar_lea.vmem %s720_s1, %s359_s4  ;;  %s270_s13 = sshll.u32 %s267_s30, 4  ;;  %s271_s13 = int_to_ptr.hbm [resolvable:$true] %s270_s13 }
  0x1c   : > { %v175_v2 = vld [vmem:[%s166_s7] sm:$0xf]  ;;  %s465_s4 = sshra.s32 %s271_s13, 4  ;;  %s471_s8 = scalar_lea.hbm %s721_s2, 512  ;;  %s466_s4 = int_to_ptr.hbm [resolvable:$true] %s465_s4 }
  0x1d   : > { %375 = vmatpush.msk.msra.mxu2 %vm201_vm0, %v175_v2  ;;  %376 = vmatpush.msk.msra.mxu3 %vm201_vm0, %v175_v2  ;;  %s467_s5 = scalar_lea.hbm %s466_s4, 64  ;;  %p472_p4 = scmp.lt.s32.totalorder %s466_s4, %s721_s2 }
  0x1e   : > { %365 = vmatmul.msk.f32.vlgmr.msra.gmra.mxu2 %vm176_vm1, %v171_v0  ;;  %367 = vmatmul.msk.f32.vlgmr.msra.gmra.mxu3 %vm176_vm1, %v173_v1  ;;  %p468_p0 = scmp.ne.s32.totalorder %s466_s4, %s467_s5  ;;  %p473_p5 = scmp.lt.s32.totalorder %s471_s8, %s467_s5 }
  0x1f   : > { %360 = vmatpush.msk.msra.mxu0 %vm201_vm0, %v175_v2  ;;  %374 = vmatpush.msk.msra.mxu1 %vm201_vm0, %v175_v2 }
  0x20   : > { %361 = vmatmul.msk.f32.vlgmr.msra.gmra.mxu0 %vm176_vm1, %v167_v3  ;;  %363 = vmatmul.msk.f32.vlgmr.msra.gmra.mxu1 %vm176_vm1, %v169_v4  ;;  %p469_p1 = pnand %p468_p0, %p616_p3  ;;  %p474_p6 = por %p473_p5, %p472_p4 }
  0x22   : > { %p470_p2 = pneg %p469_p1 }
  0x24   : > { %p475_p7 = pnand %p474_p6, %p470_p2 }
  0x26   : > { %366 = vmatmul.msk.f32.gmra.mxu2 %vm176_vm1, %v172_v5  ;;  %368 = vmatmul.msk.f32.gmra.mxu3 %vm176_vm1, %v174_v6 }
  0x28   : > { %362 = vmatmul.msk.f32.gmra.mxu0 %vm176_vm1, %v168_v7  ;;  %364 = vmatmul.msk.f32.gmra.mxu1 %vm176_vm1, %v170_v8 }
  0x9d   : > { %v222_v9 = vpop.f32.mrf.mxu0  ;;  %v228_v10 = vpop.f32.mrf.mxu1 }
  0x9e   : > { %246 = vst [vmem:[%s158_s25] sm:$0xff] %v222_v9 }
  0x9f   : > { %248 = vst [vmem:[%s158_s25 + $0x10] sm:$0xff] %v228_v10 }
  0xa1   : > { %v234_v11 = vpop.f32.mrf.mxu2  ;;  %v240_v12 = vpop.f32.mrf.mxu3 }
  0xa2   : > { %250 = vst [vmem:[%s158_s25 + $0x20] sm:$0xff] %v234_v11 }
  0xa3   : > { %252 = vst [vmem:[%s158_s25 + $0x30] sm:$0xff] %v240_v12 }
  0xa5   : > { %v225_v13 = vpop.f32.mrf.mxu0  ;;  %v231_v14 = vpop.f32.mrf.mxu1 }
  0xa6   : > { %247 = vst [vmem:[%s158_s25 + $0x8] sm:$0xff] %v225_v13 }
  0xa7   : > { %249 = vst [vmem:[%s158_s25 + $0x18] sm:$0xff] %v231_v14 }
  0xa9   : > { %v237_v15 = vpop.f32.mrf.mxu2  ;;  %v243_v16 = vpop.f32.mrf.mxu3 }
  0xaa   : > { %251 = vst [vmem:[%s158_s25 + $0x28] sm:$0xff] %v237_v15 }
  0xab   : > { %253 = vst [vmem:[%s158_s25 + $0x38] sm:$0xff] %v243_v16 }
  0xac   : > { %478 = shalt.err (!%p475_p7)
}
  0xad   : > { %s547_s17 = smov 128   ;;  %s548_s24 = smov 512  }
  0xae   : > { %s549_s25 = smov 8  }
  0xaf   : > { %377 = dma.vmem_to_hbm [thread:$0]  (%p616_p3), %s269_s3, 1024, %s271_s13, %s255_s12, %s547_s17, %s548_s24, %s549_s25  }
  0xb0 PF: > { %p383_p9 = scmp.ge.s32.totalorder %s545_s16, 2  ;;  %s285_s26 = sand.u32 1, %s517_s9  }
  0xb1   : > { %s286_s28 = scalar_lea.sflag [#allocation3], %s285_s26 }
  0xb2   : > { %p380_p10 = pnand %p383_p9, %p625_p8 }
  0xb4   : > { %p381_p11 = pneg %p380_p10 }
  0xb6   : > { %512 = dma.done.wait (%p381_p11), %s286_s28, 1024  }
  0xb7   : > { %514 = vsyncadd (%p381_p11), %s286_s28, 4294966272  ;;  %s15_s16 = sadd.s32 1, %s545_s16   ;;  %s724_s9 = smov %s521_s10 }
  0xb8   : > { %p12_p12 = scmp.ge.s32.totalorder %s15_s16, 10   ;;  %s725_s10 = smov %s525_s11 }
  0xb9   : > { %s726_s11 = smov %s634_s27  ;;  %s727_s12 = smov %s537_s14 }
  0xba   : > { %s728_s13 = smov %s541_s15  ;;  %s729_s14 = smov %s732_s19 }
  0xbb   : > { %s730_s15 = smov %s736_s20  ;;  %14 = sbr.rel (!%p12_p12) target bundleno = 5 (0x5), region = 63 }
  0xc0   :  { %292 = vsyncpa [#allocation3], 1 }
  0xc1   :  { %294 = vsyncpa [#allocation3 + $0x1], 1 }

</bundles_post_ra>
